<compile_context>
chip_gen: v7x
topology: tpu7x:2x2x1
jax: 0.10.0
libtpu: 0.0.40
codegen_flags: <defaults>
</compile_context>

<pallas_src>
import jax
import jax.numpy as jnp
from jax import lax
from jax.experimental import pallas as pl
from jax.experimental.pallas import tpu as pltpu


def _round_up(x, m):
    return (x + m - 1) // m * m


def cl_kernel(x1_ref, x2_ref, w1_ref, b1_ref, w2_ref, b2_ref, out_ref):
    """One row-tile of the CL forward pass.

    Row-major inputs, feature-major compute (rows live on the lane axis after
    the first matmul, so every reduction is a cheap sublane reduction and the
    cosine output is a lane-dense [1, tile_n] row):
      x1_ref, x2_ref : [tile_n, IN]
      w1_ref : [H, IN]    b1_ref : [H, 1]      (resident across the grid)
      w2_ref : [OUT, H]   b2_ref : [OUT, 1]
      out_ref: [1, tile_n]
    """
    w1 = w1_ref[...]
    b1 = b1_ref[...]
    w2 = w2_ref[...]
    b2 = b2_ref[...]

    def branch(x):                                              # x: [T, IN]
        # Linear1 + bias: contract the IN (lane) axes of W1 and x directly on
        # the MXU -> [H, T]; f32 accumulation.
        h = lax.dot_general(
            w1, x, dimension_numbers=(((1,), (1,)), ((), ())),
            preferred_element_type=jnp.float32) + b1
        h = jax.nn.sigmoid(h)                                   # [H, T] f32
        # 0.1 * F.normalize(h, dim=feature, eps=1e-12) via rsqrt, with the 0.1
        # folded into the [1, T] row (not the [H, T] tensor):
        #   0.1 / max(sqrt(s), 1e-12) == 0.1 * rsqrt(max(s, 1e-24))
        ssq = jnp.sum(h * h, axis=0, keepdims=True)             # [1, T]
        inv = 0.1 * lax.rsqrt(jnp.maximum(ssq, 1e-24))
        h = (h * inv).astype(w2.dtype)                          # bf16 MXU path
        # Linear2 + bias: [OUT, H] @ [H, T] -> [OUT, T], f32 accumulation.
        return jnp.dot(w2, h, preferred_element_type=jnp.float32) + b2

    y1 = branch(x1_ref[...])
    y2 = branch(x2_ref[...])

    # CosineSimilarity(dim=-1, eps=1e-8):
    #   dot / max(||y1||*||y2||, 1e-8) == dot * rsqrt(max(s1*s2, 1e-16))
    num = jnp.sum(y1 * y2, axis=0, keepdims=True)               # [1, T]
    s1 = jnp.sum(y1 * y1, axis=0, keepdims=True)
    s2 = jnp.sum(y2 * y2, axis=0, keepdims=True)
    out_ref[...] = num * lax.rsqrt(jnp.maximum(s1 * s2, 1e-16))


def _choose_tiling(n, itemsize):
    """Pick (tile_n, padded_n).

    Large lane-dense tiles (~1 MiB of x per step per branch) so the ~0.35 us
    per-grid-step overhead is amortized; force >=2 tiles once there is enough
    work so both v7x TensorCores are used. Footprint stays far under the
    32 MiB scoped VMEM default on all generations.
    """
    cap = 8192 if itemsize <= 2 else 4096
    if n <= 256:                       # tiny problem: one padded tile
        tile = _round_up(max(n, 1), 128)
        return tile, tile
    num_tiles = max(2, -(-n // cap))
    tile = _round_up(-(-n // num_tiles), 128)
    return tile, tile * num_tiles


def cl_forward(x1, x2, w1, b1, w2, b2, *, tile_n=None,
               compute_dtype=jnp.bfloat16):
    """Pallas wrapper.

    x1, x2: [N, IN].  w1: [H, IN], b1: [H], w2: [OUT, H], b2: [OUT]
    (native PyTorch nn.Linear layouts — no weight transpose needed).
    Returns cosine similarity of shape [N].

    compute_dtype=bf16 (default) halves HBM traffic for the only streamed
    operand (x) and uses the bf16 MXU on v5e/v6e/v7x; pass jnp.float32 for
    tight numerical parity.
    """
    n, in_dim = x1.shape
    assert x2.shape == (n, in_dim)
    hid = w1.shape[0]
    out_dim = w2.shape[0]

    itemsize = jnp.dtype(compute_dtype).itemsize
    if tile_n is None:
        tile_n, n_pad = _choose_tiling(n, itemsize)
    else:
        tile_n = _round_up(max(tile_n, 1), 128)
        n_pad = _round_up(n, tile_n)
    num_tiles = n_pad // tile_n

    # x streams straight from HBM row-major — no wrapper transpose/concat pass.
    x1c = jnp.asarray(x1, compute_dtype)
    x2c = jnp.asarray(x2, compute_dtype)
    if n_pad != n:
        # Ragged N: pad rows with zeros (padded lanes produce finite junk that
        # is sliced off below). Only costs a copy when N isn't tile-aligned.
        pad = ((0, n_pad - n), (0, 0))
        x1c = jnp.pad(x1c, pad)
        x2c = jnp.pad(x2c, pad)

    w1c = jnp.asarray(w1, compute_dtype)                    # [H, IN]
    w2c = jnp.asarray(w2, compute_dtype)                    # [OUT, H]
    b1c = jnp.asarray(b1, jnp.float32).reshape(hid, 1)      # [H, 1]
    b2c = jnp.asarray(b2, jnp.float32).reshape(out_dim, 1)  # [OUT, 1]

    cost = pl.CostEstimate(
        flops=4 * n_pad * (in_dim * hid + hid * out_dim),
        transcendentals=2 * n_pad * hid + 4 * n_pad,
        bytes_accessed=(2 * n_pad * in_dim + in_dim * hid + hid * out_dim)
        * itemsize + 4 * (n_pad + hid + out_dim),
    )

    out = pl.pallas_call(
        cl_kernel,
        out_shape=jax.ShapeDtypeStruct((1, n_pad), jnp.float32),
        grid=(num_tiles,),
        in_specs=[
            pl.BlockSpec((tile_n, in_dim), lambda i: (i, 0)),   # x1 row tile
            pl.BlockSpec((tile_n, in_dim), lambda i: (i, 0)),   # x2 row tile
            pl.BlockSpec((hid, in_dim), lambda i: (0, 0)),      # W1 (resident)
            pl.BlockSpec((hid, 1), lambda i: (0, 0)),           # b1
            pl.BlockSpec((out_dim, hid), lambda i: (0, 0)),     # W2 (resident)
            pl.BlockSpec((out_dim, 1), lambda i: (0, 0)),       # b2
        ],
        out_specs=pl.BlockSpec((1, tile_n), lambda i: (0, i)),  # lane-dense
        compiler_params=pltpu.CompilerParams(
            dimension_semantics=("parallel",),
        ),
        cost_estimate=cost,
    )(x1c, x2c, w1c, b1c, w2c, b2c)

    return out[0, :n]


def cl_reference(x1, x2, w1, b1, w2, b2):
    """Pure-JAX reference mirroring the PyTorch forward."""
    def embed(x):
        h = jax.nn.sigmoid(x @ w1.T + b1)
        nrm = jnp.sqrt(jnp.sum(h * h, axis=-1, keepdims=True))
        h = 0.1 * h / jnp.maximum(nrm, 1e-12)
        return h @ w2.T + b2

    y1 = embed(x1.astype(jnp.float32))
    y2 = embed(x2.astype(jnp.float32))
    dot = jnp.sum(y1 * y2, axis=-1)
    n1 = jnp.sqrt(jnp.sum(y1 * y1, axis=-1))
    n2 = jnp.sqrt(jnp.sum(y2 * y2, axis=-1))
    return dot / jnp.maximum(n1 * n2, 1e-8)


if __name__ == "__main__":
    # Small shapes consistent with the module: inputs=32, hidden=32, outputs=16.
    N, IN, HID, OUT = 16, 32, 32, 16

    key = jax.random.PRNGKey(0)
    k_x1, k_x2, k_w1, k_b1, k_w2, k_b2, k_y1, k_y2 = jax.random.split(key, 8)

    x1 = jax.random.normal(k_x1, (N, IN), jnp.float32)
    x2 = jax.random.normal(k_x2, (N, IN), jnp.float32)

    # Deterministic parameters (PyTorch nn.Linear shapes: [out, in], [out]).
    bound1 = 1.0 / (IN ** 0.5)
    bound2 = 1.0 / (HID ** 0.5)
    w1 = jax.random.uniform(k_w1, (HID, IN), jnp.float32, -bound1, bound1)
    b1 = jax.random.uniform(k_b1, (HID,), jnp.float32, -bound1, bound1)
    w2 = jax.random.uniform(k_w2, (OUT, HID), jnp.float32, -bound2, bound2)
    b2 = jax.random.uniform(k_b2, (OUT,), jnp.float32, -bound2, bound2)

    cos_ref = cl_reference(x1, x2, w1, b1, w2, b2)

    # f32 path (tight numerical check).
    cos_f32 = jax.block_until_ready(
        cl_forward(x1, x2, w1, b1, w2, b2, compute_dtype=jnp.float32))
    assert cos_f32.shape == (N,)
    assert jnp.allclose(cos_f32, cos_ref, atol=1e-4, rtol=1e-4), (cos_f32, cos_ref)

    # bf16 production default (streamed operands halved; looser tolerance).
    cos_bf16 = jax.block_until_ready(cl_forward(x1, x2, w1, b1, w2, b2))
    assert cos_bf16.shape == (N,)
    assert jnp.allclose(cos_bf16, cos_ref, atol=5e-2, rtol=5e-2), (cos_bf16, cos_ref)

    # Ragged, multi-tile path: N=300 with tile_n=128 -> 3 tiles + padding.
    N2 = 300
    x1b = jax.random.normal(k_y1, (N2, IN), jnp.float32)
    x2b = jax.random.normal(k_y2, (N2, IN), jnp.float32)
    cos_b = jax.block_until_ready(
        cl_forward(x1b, x2b, w1, b1, w2, b2, tile_n=128,
                   compute_dtype=jnp.float32))
    ref_b = cl_reference(x1b, x2b, w1, b1, w2, b2)
    assert cos_b.shape == (N2,)
    assert jnp.allclose(cos_b, ref_b, atol=1e-4, rtol=1e-4), (cos_b, ref_b)

    print("KERNEL_OK")
</pallas_src>

<mosaic_0001>
module attributes {stable_mosaic.version = 11 : i64} {
  func.func @cl_kernel(%arg0: i32, %arg1: memref<128x32xf32, #tpu.memory_space<vmem>>, %arg2: memref<128x32xf32, #tpu.memory_space<vmem>>, %arg3: memref<32x32xf32, #tpu.memory_space<vmem>>, %arg4: memref<32x1xf32, #tpu.memory_space<vmem>>, %arg5: memref<16x32xf32, #tpu.memory_space<vmem>>, %arg6: memref<16x1xf32, #tpu.memory_space<vmem>>, %arg7: memref<1x128xf32, #tpu.memory_space<vmem>>) attributes {dimension_semantics = [#tpu.dimension_semantics<parallel>], iteration_bounds = array<i64: 1>, scalar_prefetch = 0 : i64, scratch_operands = 0 : i64, tpu.core_type = #tpu.core_type<tc>, window_params = [{transform_indices = @transform_0, window_bounds = array<i64: 128, 32>}, {transform_indices = @transform_1, window_bounds = array<i64: 128, 32>}, {pipeline_mode = #tpu.pipeline_mode<synchronous>, transform_indices = @transform_2, window_bounds = array<i64: 32, 32>}, {pipeline_mode = #tpu.pipeline_mode<synchronous>, transform_indices = @transform_3, window_bounds = array<i64: 32, 1>}, {pipeline_mode = #tpu.pipeline_mode<synchronous>, transform_indices = @transform_4, window_bounds = array<i64: 16, 32>}, {pipeline_mode = #tpu.pipeline_mode<synchronous>, transform_indices = @transform_5, window_bounds = array<i64: 16, 1>}, {transform_indices = @transform_6, window_bounds = array<i64: 1, 128>}]} {
    %c0 = arith.constant 0 : index
    %c0_0 = arith.constant 0 : index
    %0 = vector.load %arg3[%c0, %c0_0] : memref<32x32xf32, #tpu.memory_space<vmem>>, vector<32x32xf32>
    %c0_1 = arith.constant 0 : index
    %c0_2 = arith.constant 0 : index
    %1 = vector.load %arg4[%c0_1, %c0_2] : memref<32x1xf32, #tpu.memory_space<vmem>>, vector<32x1xf32>
    %c0_3 = arith.constant 0 : index
    %c0_4 = arith.constant 0 : index
    %2 = vector.load %arg5[%c0_3, %c0_4] : memref<16x32xf32, #tpu.memory_space<vmem>>, vector<16x32xf32>
    %c0_5 = arith.constant 0 : index
    %c0_6 = arith.constant 0 : index
    %3 = vector.load %arg6[%c0_5, %c0_6] : memref<16x1xf32, #tpu.memory_space<vmem>>, vector<16x1xf32>
    %c0_7 = arith.constant 0 : index
    %c0_8 = arith.constant 0 : index
    %4 = vector.load %arg1[%c0_7, %c0_8] : memref<128x32xf32, #tpu.memory_space<vmem>>, vector<128x32xf32>
    %cst = arith.constant dense<0.000000e+00> : vector<32x128xf32>
    %5 = tpu.matmul %0, %4, %cst {dimension_numbers = #tpu.dot_dimension_numbers<[1], [1], [0], [0], [0, 0, 1, 0], [], []>} : vector<32x32xf32>, vector<128x32xf32>, vector<32x128xf32> -> vector<32x128xf32>
    %6 = vector.broadcast %1 : vector<32x1xf32> to vector<32x128xf32>
    %7 = arith.addf %5, %6 : vector<32x128xf32>
    %8 = arith.negf %7 : vector<32x128xf32>
    %9 = math.exp %8 : vector<32x128xf32>
    %cst_9 = arith.constant 1.000000e+00 : f32
    %10 = vector.broadcast %cst_9 : f32 to vector<32x128xf32>
    %11 = arith.addf %10, %9 : vector<32x128xf32>
    %12 = arith.divf %10, %11 : vector<32x128xf32>
    %13 = arith.mulf %12, %12 : vector<32x128xf32>
    %cst_10 = arith.constant dense<0.000000e+00> : vector<128xf32>
    %14 = vector.multi_reduction <add>, %13, %cst_10 [0] : vector<32x128xf32> to vector<128xf32>
    %15 = vector.shape_cast %14 : vector<128xf32> to vector<1x128xf32>
    %cst_11 = arith.constant 1.000000e-24 : f32
    %16 = vector.broadcast %cst_11 : f32 to vector<1x128xf32>
    %17 = arith.maximumf %15, %16 : vector<1x128xf32>
    %18 = math.rsqrt %17 : vector<1x128xf32>
    %cst_12 = arith.constant 1.000000e-01 : f32
    %19 = vector.broadcast %cst_12 : f32 to vector<1x128xf32>
    %20 = arith.mulf %19, %18 : vector<1x128xf32>
    %21 = vector.broadcast %20 : vector<1x128xf32> to vector<32x128xf32>
    %22 = arith.mulf %12, %21 : vector<32x128xf32>
    %cst_13 = arith.constant dense<0.000000e+00> : vector<16x128xf32>
    %23 = tpu.matmul %2, %22, %cst_13 {dimension_numbers = #tpu.dot_dimension_numbers<[1], [0], [0], [1], [0, 0, 1, 1], [], []>} : vector<16x32xf32>, vector<32x128xf32>, vector<16x128xf32> -> vector<16x128xf32>
    %24 = vector.broadcast %3 : vector<16x1xf32> to vector<16x128xf32>
    %25 = arith.addf %23, %24 : vector<16x128xf32>
    %c0_14 = arith.constant 0 : index
    %c0_15 = arith.constant 0 : index
    %26 = vector.load %arg2[%c0_14, %c0_15] : memref<128x32xf32, #tpu.memory_space<vmem>>, vector<128x32xf32>
    %cst_16 = arith.constant dense<0.000000e+00> : vector<32x128xf32>
    %27 = tpu.matmul %0, %26, %cst_16 {dimension_numbers = #tpu.dot_dimension_numbers<[1], [1], [0], [0], [0, 0, 1, 0], [], []>} : vector<32x32xf32>, vector<128x32xf32>, vector<32x128xf32> -> vector<32x128xf32>
    %28 = vector.broadcast %1 : vector<32x1xf32> to vector<32x128xf32>
    %29 = arith.addf %27, %28 : vector<32x128xf32>
    %30 = arith.negf %29 : vector<32x128xf32>
    %31 = math.exp %30 : vector<32x128xf32>
    %cst_17 = arith.constant 1.000000e+00 : f32
    %32 = vector.broadcast %cst_17 : f32 to vector<32x128xf32>
    %33 = arith.addf %32, %31 : vector<32x128xf32>
    %34 = arith.divf %32, %33 : vector<32x128xf32>
    %35 = arith.mulf %34, %34 : vector<32x128xf32>
    %cst_18 = arith.constant dense<0.000000e+00> : vector<128xf32>
    %36 = vector.multi_reduction <add>, %35, %cst_18 [0] : vector<32x128xf32> to vector<128xf32>
    %37 = vector.shape_cast %36 : vector<128xf32> to vector<1x128xf32>
    %cst_19 = arith.constant 1.000000e-24 : f32
    %38 = vector.broadcast %cst_19 : f32 to vector<1x128xf32>
    %39 = arith.maximumf %37, %38 : vector<1x128xf32>
    %40 = math.rsqrt %39 : vector<1x128xf32>
    %cst_20 = arith.constant 1.000000e-01 : f32
    %41 = vector.broadcast %cst_20 : f32 to vector<1x128xf32>
    %42 = arith.mulf %41, %40 : vector<1x128xf32>
    %43 = vector.broadcast %42 : vector<1x128xf32> to vector<32x128xf32>
    %44 = arith.mulf %34, %43 : vector<32x128xf32>
    %cst_21 = arith.constant dense<0.000000e+00> : vector<16x128xf32>
    %45 = tpu.matmul %2, %44, %cst_21 {dimension_numbers = #tpu.dot_dimension_numbers<[1], [0], [0], [1], [0, 0, 1, 1], [], []>} : vector<16x32xf32>, vector<32x128xf32>, vector<16x128xf32> -> vector<16x128xf32>
    %46 = vector.broadcast %3 : vector<16x1xf32> to vector<16x128xf32>
    %47 = arith.addf %45, %46 : vector<16x128xf32>
    %48 = arith.mulf %25, %47 : vector<16x128xf32>
    %cst_22 = arith.constant dense<0.000000e+00> : vector<128xf32>
    %49 = vector.multi_reduction <add>, %48, %cst_22 [0] : vector<16x128xf32> to vector<128xf32>
    %50 = vector.shape_cast %49 : vector<128xf32> to vector<1x128xf32>
    %51 = arith.mulf %25, %25 : vector<16x128xf32>
    %cst_23 = arith.constant dense<0.000000e+00> : vector<128xf32>
    %52 = vector.multi_reduction <add>, %51, %cst_23 [0] : vector<16x128xf32> to vector<128xf32>
    %53 = vector.shape_cast %52 : vector<128xf32> to vector<1x128xf32>
    %54 = arith.mulf %47, %47 : vector<16x128xf32>
    %cst_24 = arith.constant dense<0.000000e+00> : vector<128xf32>
    %55 = vector.multi_reduction <add>, %54, %cst_24 [0] : vector<16x128xf32> to vector<128xf32>
    %56 = vector.shape_cast %55 : vector<128xf32> to vector<1x128xf32>
    %57 = arith.mulf %53, %56 : vector<1x128xf32>
    %cst_25 = arith.constant 1.000000e-16 : f32
    %58 = vector.broadcast %cst_25 : f32 to vector<1x128xf32>
    %59 = arith.maximumf %57, %58 : vector<1x128xf32>
    %60 = math.rsqrt %59 : vector<1x128xf32>
    %61 = arith.mulf %50, %60 : vector<1x128xf32>
    %c0_26 = arith.constant 0 : index
    %c0_27 = arith.constant 0 : index
    %62 = vector.load %arg7[%c0_26, %c0_27] : memref<1x128xf32, #tpu.memory_space<vmem>>, vector<1x128xf32>
    tpu.vector_store %arg7[%c0_26, %c0_27], %61 {strides = array<i32>} : memref<1x128xf32, #tpu.memory_space<vmem>>, vector<1x128xf32>,
    return
  }
  func.func @transform_0(%arg0: i32) -> (i32, i32) {
    %c0_i32 = arith.constant 0 : i32
    %c0_i32_0 = arith.constant 0 : i32
    return %arg0, %c0_i32 : i32, i32
  }
  func.func @transform_1(%arg0: i32) -> (i32, i32) {
    %c0_i32 = arith.constant 0 : i32
    %c0_i32_0 = arith.constant 0 : i32
    return %arg0, %c0_i32 : i32, i32
  }
  func.func @transform_2(%arg0: i32) -> (i32, i32) {
    %c0_i32 = arith.constant 0 : i32
    %c0_i32_0 = arith.constant 0 : i32
    %c0_i32_1 = arith.constant 0 : i32
    return %c0_i32, %c0_i32_0 : i32, i32
  }
  func.func @transform_3(%arg0: i32) -> (i32, i32) {
    %c0_i32 = arith.constant 0 : i32
    %c0_i32_0 = arith.constant 0 : i32
    %c0_i32_1 = arith.constant 0 : i32
    return %c0_i32, %c0_i32_0 : i32, i32
  }
  func.func @transform_4(%arg0: i32) -> (i32, i32) {
    %c0_i32 = arith.constant 0 : i32
    %c0_i32_0 = arith.constant 0 : i32
    %c0_i32_1 = arith.constant 0 : i32
    return %c0_i32, %c0_i32_0 : i32, i32
  }
  func.func @transform_5(%arg0: i32) -> (i32, i32) {
    %c0_i32 = arith.constant 0 : i32
    %c0_i32_0 = arith.constant 0 : i32
    %c0_i32_1 = arith.constant 0 : i32
    return %c0_i32, %c0_i32_0 : i32, i32
  }
  func.func @transform_6(%arg0: i32) -> (i32, i32) {
    %c0_i32 = arith.constant 0 : i32
    %c0_i32_0 = arith.constant 0 : i32
    return %c0_i32, %arg0 : i32, i32
  }
}

</mosaic_0001>

<bundles_post_ra>
// kernel: tpu_custom_call.1
= control target key start
LH: loop header
LB: loop body
LE: loop exit
PB: predicated region body
PF: predicated region fallthrough
CT: control target
= control target key end

     0   :  { %vm72_vm0 = vcmask 261120   ;;  %v1047_v6 = vmov 0   ;;  %s1368_s0 = inlined_call_operand.vmem [shape: f32[128,32], index: 0, kind: input, shape index: {}]   ;;  %s1369_s1 = inlined_call_operand.vmem [shape: f32[128,32], index: 1, kind: input, shape index: {}]   ;;  %s1370_s2 = inlined_call_operand.vmem [shape: f32[32,32], index: 2, kind: input, shape index: {}]   ;;  %s1371_s3 = inlined_call_operand.vmem [shape: f32[32,1], index: 3, kind: input, shape index: {}]   ;;  %s1372_s4 = inlined_call_operand.vmem [shape: f32[16,32], index: 4, kind: input, shape index: {}]   ;;  %s1373_s5 = inlined_call_operand.vmem [shape: f32[16,1], index: 5, kind: input, shape index: {}]   ;;  %s1374_s6 = inlined_call_operand.hbm [shape: f32[1,128], index: 6, kind: output, shape index: {}]  }
   0x1   :  { %v36_v0 = vld [vmem:[%s1368_s0] sm:$0xff]  ;;  %v37_v1 = vld [vmem:[%s1368_s0 + $0x8] sm:$0xff]  ;;  %v38_v2 = vld [vmem:[%s1368_s0 + $0x10] sm:$0xff]  ;;  %983 = vset.pattern.permute.xlu0 %v1047_v6  ;;  %984 = vset.pattern.permute.xlu1 %v1047_v6 }
   0x2   :  { %v869_v3 = vpack.c.bf16 %v37_v1, %v36_v0  ;;  %vm1095_vm1 = vmpackc.low %vm72_vm0, %vm72_vm0  ;;  %v39_v5 = vld [vmem:[%s1368_s0 + $0x18] sm:$0xff]  ;;  %v1111_v8 = vld [vmem:[%s1370_s2] sm:$0xff] }
   0x3   :  { %v875_v7 = vpack.c.bf16 %v39_v5, %v38_v2  ;;  %v40_v9 = vld [vmem:[%s1368_s0 + $0x20] sm:$0xff]  ;;  %v41_v10 = vld [vmem:[%s1368_s0 + $0x28] sm:$0xff]  ;;  %803 = vmatprep.mubr.msk.f32.mxu0 %vm72_vm0, %v1111_v8  ;;  %v30_v12 = vld [vmem:[%s1371_s3 + $0x10] sm:$0xff] }
   0x4   :  { %871 = vmatprep.subr.msk.bf16.mxu0 %vm1095_vm1, %v869_v3  ;;  %v28_v11 = vld [vmem:[%s1371_s3] sm:$0xff]  ;;  %64 = vperm.xlu1 %984, %v30_v12   ;;  %v881_v13 = vpack.c.bf16 %v41_v10, %v40_v9  ;;  %v29_v14 = vld [vmem:[%s1371_s3 + $0x8] sm:$0xff] }
   0x5   :  { %874 = vmatpush3.bf16.xpose.msk.msra.mxu0 %vm1095_vm1, %v869_v3  ;;  %54 = vperm.xlu0 %983, %v28_v11  }
   0x6   :  { %877 = vmatprep.subr.msk.bf16.mxu0 %vm1095_vm1, %v875_v7 }
   0x7   :  { %11 = vsyncpa [#allocation3], 0  ;;  %v31_v15 = vld [vmem:[%s1371_s3 + $0x18] sm:$0xff]  ;;  %v34_v16 = vld [vmem:[%s1373_s5] sm:$0xff] }
   0x8   :  { %69 = vperm.xlu1 %984, %v31_v15   ;;  %v42_v17 = vld [vmem:[%s1368_s0 + $0x30] sm:$0xff]  ;;  %v43_v18 = vld [vmem:[%s1368_s0 + $0x38] sm:$0xff]  ;;  %v35_v19 = vld [vmem:[%s1373_s5 + $0x8] sm:$0xff] }
   0x9   :  { %59 = vperm.xlu0 %983, %v29_v14   ;;  %v887_v20 = vpack.c.bf16 %v43_v18, %v42_v17  ;;  %v44_v21 = vld [vmem:[%s1368_s0 + $0x40] sm:$0xff]  ;;  %v45_v22 = vld [vmem:[%s1368_s0 + $0x48] sm:$0xff]  ;;  %v46_v24 = vld [vmem:[%s1368_s0 + $0x50] sm:$0xff] }
   0xa   :  { %v893_v23 = vpack.c.bf16 %v45_v22, %v44_v21  ;;  %v47_v25 = vld [vmem:[%s1368_s0 + $0x58] sm:$0xff]  ;;  %v48_v27 = vld [vmem:[%s1368_s0 + $0x60] sm:$0xff]  ;;  %v49_v28 = vld [vmem:[%s1368_s0 + $0x68] sm:$0xff] }
   0xb   :  { %v899_v26 = vpack.c.bf16 %v47_v25, %v46_v24  ;;  %v905_v29 = vpack.c.bf16 %v49_v28, %v48_v27  ;;  %v50_v30 = vld [vmem:[%s1368_s0 + $0x70] sm:$0xff]  ;;  %v51_v31 = vld [vmem:[%s1368_s0 + $0x78] sm:$0xff]  ;;  %v1198_v33 = vld [vmem:[%s1370_s2 + $0x8] sm:$0xff] }
   0xc   :  { %269 = vperm.xlu1 %984, %v35_v19   ;;  %v911_v32 = vpack.c.bf16 %v51_v31, %v50_v30  ;;  %v1203_v34 = vld [vmem:[%s1370_s2 + $0x10] sm:$0xff]  ;;  %v1212_v35 = vld [vmem:[%s1370_s2 + $0x18] sm:$0xff]  ;;  %v32_v36 = vld [vmem:[%s1372_s4] sm:$0xff] }
   0xd   :  { %880 = vmatpush3.bf16.xpose.msk.msra.mxu0 %vm1095_vm1, %v875_v7  ;;  %264 = vperm.xlu0 %983, %v34_v16   ;;  %v353_v25 = vld [vmem:[%s1369_s1] sm:$0xff]  ;;  %v1242_v28 = vld [vmem:[%s1372_s4 + $0x8] sm:$0xff]  ;;  %v356_v30 = vld [vmem:[%s1369_s1 + $0x18] sm:$0xff] }
   0xe   :  { %883 = vmatprep.subr.msk.bf16.mxu0 %vm1095_vm1, %v881_v13  ;;  %817 = vmatprep.mubr.msk.f32.mxu1 %vm72_vm0, %v32_v36 }
  0x15   :  { %886 = vmatpush3.bf16.xpose.msk.msra.mxu0 %vm1095_vm1, %v881_v13 }
  0x16   :  { %889 = vmatprep.subr.msk.bf16.mxu0 %vm1095_vm1, %v887_v20 }
  0x1d   :  { %892 = vmatpush3.bf16.xpose.msk.msra.mxu0 %vm1095_vm1, %v887_v20 }
  0x1e   :  { %895 = vmatprep.subr.msk.bf16.mxu0 %vm1095_vm1, %v893_v23 }
  0x25   :  { %898 = vmatpush3.bf16.xpose.msk.msra.mxu0 %vm1095_vm1, %v893_v23 }
  0x26   :  { %901 = vmatprep.subr.msk.bf16.mxu0 %vm1095_vm1, %v899_v26 }
  0x2d   :  { %904 = vmatpush3.bf16.xpose.msk.msra.mxu0 %vm1095_vm1, %v899_v26  ;;  %v354_v26 = vld [vmem:[%s1369_s1 + $0x8] sm:$0xff] }
  0x2e   :  { %907 = vmatprep.subr.msk.bf16.mxu0 %vm1095_vm1, %v905_v29  ;;  %v925_v27 = vpack.c.bf16 %v354_v26, %v353_v25 }
  0x35   :  { %910 = vmatpush3.bf16.xpose.msk.msra.mxu0 %vm1095_vm1, %v905_v29  ;;  %v355_v29 = vld [vmem:[%s1369_s1 + $0x10] sm:$0xff] }
  0x36   :  { %913 = vmatprep.subr.msk.bf16.mxu0 %vm1095_vm1, %v911_v32  ;;  %v931_v31 = vpack.c.bf16 %v356_v30, %v355_v29 }
  0x3d   :  { %916 = vmatpush3.bf16.xpose.msk.msra.mxu0 %vm1095_vm1, %v911_v32  ;;  %v357_v32 = vld [vmem:[%s1369_s1 + $0x20] sm:$0xff] }
  0x44   :  { %804 = vmatmul.mubr.msk.f32.vlgmr.msra.gmra.mrb[0].mxu0 %vm72_vm0, %v1198_v33 }
  0x45   :  { %806 = vmatprep.mubr.msk.f32.mxu0 %vm72_vm0, %v1203_v34 }
  0x48   :  { %807 = vmatmul.mubr.msk.f32.gmra.mrb[2].mxu0 %vm72_vm0, %v1212_v35 }
  0x49   :  { %866 = vmatprep.mubr.msk.f32.mxu0 %vm72_vm0, %v32_v36  ;;  %v358_v36 = vld [vmem:[%s1369_s1 + $0x28] sm:$0xff] }
  0x83   :  { %v1223_v38 = vpop.permute.xlu1 %64 }
  0x84   :  { %v1221_v37 = vpop.permute.xlu0 %54 }
  0x87   :  { %v1229_v45 = vpop.permute.xlu1 %69 }
  0x88   :  { %v1225_v39 = vpop.permute.xlu0 %59 }
 0x117   :  { %v805_v40 = vpop.f32.mrb[0].mxu0 }
 0x118   :  { %v205_v41 = vadd.f32 %v805_v40, %v1225_v39  ;;  %v199_v42 = vpop.f32.mrb[1].mxu0  ;;  %v937_v40 = vpack.c.bf16 %v358_v36, %v357_v32 }
 0x119   :  { %v200_v43 = vadd.f32 %v199_v42, %v1221_v37 }
 0x11a   :  { %v688_v44 = vmul.f32 -1.442695, %v205_v41  ;;  %v360_v41 = vld [vmem:[%s1369_s1 + $0x38] sm:$0xff] }
 0x11b   :  { %v687_v46 = vmul.f32 -1.442695, %v200_v43  ;;  %v808_v47 = vpop.f32.mrb[2].mxu0  ;;  %v361_v43 = vld [vmem:[%s1369_s1 + $0x40] sm:$0xff] }
 0x11c   :  { %985 = vpow2.f32 %v688_v44  ;;  %v215_v48 = vadd.f32 %v808_v47, %v1229_v45  ;;  %v209_v49 = vpop.f32.mrb[3].mxu0  ;;  %v362_v44 = vld [vmem:[%s1369_s1 + $0x48] sm:$0xff]  ;;  %v363_v47 = vld [vmem:[%s1369_s1 + $0x50] sm:$0xff] }
 0x11d   :  { %987 = vpow2.f32 %v687_v46  ;;  %v210_v50 = vadd.f32 %v209_v49, %v1223_v38  ;;  %v949_v46 = vpack.c.bf16 %v362_v44, %v361_v43 }
 0x11e   :  { %v690_v51 = vmul.f32 -1.442695, %v215_v48  ;;  %v364_v48 = vld [vmem:[%s1369_s1 + $0x58] sm:$0xff] }
 0x11f   :  { %v689_v52 = vmul.f32 -1.442695, %v210_v50  ;;  %v955_v49 = vpack.c.bf16 %v364_v48, %v363_v47  ;;  %v365_v50 = vld [vmem:[%s1369_s1 + $0x60] sm:$0xff] }
 0x120   :  { %989 = vpow2.f32 %v690_v51  ;;  %v366_v51 = vld [vmem:[%s1369_s1 + $0x68] sm:$0xff] }
 0x121   :  { %991 = vpow2.f32 %v689_v52  ;;  %v961_v52 = vpack.c.bf16 %v366_v51, %v365_v50 }
 0x126   :  { %v986_v53 = vpop.eup %985 }
 0x127   :  { %v988_v54 = vpop.eup %987  ;;  %v231_v55 = vadd.f32 1.0, %v986_v53  ;;  %v367_v53 = vld [vmem:[%s1369_s1 + $0x70] sm:$0xff] }
 0x128   :  { %v230_v56 = vadd.f32 1.0, %v988_v54  ;;  %v368_v54 = vld [vmem:[%s1369_s1 + $0x78] sm:$0xff] }
 0x129   :  { %993 = vrcp.f32 %v231_v55  ;;  %v967_v55 = vpack.c.bf16 %v368_v54, %v367_v53 }
 0x12a   :  { %v990_v57 = vpop.eup %989  ;;  %995 = vrcp.f32 %v230_v56  ;;  %v1328_v56 = vpop.permute.xlu1 %269 }
 0x12b   :  { %v992_v58 = vpop.eup %991  ;;  %v233_v59 = vadd.f32 1.0, %v990_v57 }
 0x12c   :  { %v232_v60 = vadd.f32 1.0, %v992_v58  ;;  %v1330_v58 = vpop.permute.xlu0 %264 }
 0x12d   :  { %997 = vrcp.f32 %v233_v59 }
 0x12e   :  { %999 = vrcp.f32 %v232_v60 }
 0x133   :  { %v994_v61 = vpop.eup %993 }
 0x134   :  { %v996_v62 = vpop.eup %995  ;;  %v243_v63 = vmul.f32 %v994_v61, %v994_v61 }
 0x135   :  { %v242_v0 = vmul.f32 %v996_v62, %v996_v62 }
 0x137   :  { %v998_v1 = vpop.eup %997  ;;  %v246_v2 = vadd.f32 %v243_v63, %v242_v0 }
 0x138   :  { %v1000_v3 = vpop.eup %999  ;;  %v245_v6 = vmul.f32 %v998_v1, %v998_v1 }
 0x139   :  { %v244_v5 = vmul.f32 %v1000_v3, %v1000_v3 }
 0x13b   :  { %v247_v7 = vadd.f32 %v246_v2, %v244_v5 }
 0x13d   :  { %v248_v9 = vadd.f32 %v247_v7, %v245_v6 }
 0x13f   :  { %v249_v10 = vrot.slane %v248_v9, 4 }
 0x141   :  { %v250_v11 = vadd.f32 %v249_v10, %v248_v9 }
 0x143   :  { %v251_v12 = vrot.slane %v250_v11, 2 }
 0x145   :  { %v252_v13 = vadd.f32 %v251_v12, %v250_v11 }
 0x147   :  { %v253_v14 = vrot.slane %v252_v13, 1 }
 0x149   :  { %v254_v15 = vadd.f32 %v253_v14, %v252_v13 }
 0x14b   :  { %v255_v16 = vmax.f32 %v254_v15, 1e-24 }
 0x14d   :  { %1001 = vrsqrt.f32 %v255_v16 }
 0x157   :  { %v1002_v17 = vpop.eup %1001 }
 0x158   :  { %v257_v18 = vmul.f32 0.1, %v1002_v17 }
 0x15a   :  { %v258_v19 = vmul.f32 %v996_v62, %v257_v18  ;;  %v259_v20 = vmul.f32 %v994_v61, %v257_v18  ;;  %v260_v21 = vmul.f32 %v1000_v3, %v257_v18  ;;  %v261_v22 = vmul.f32 %v998_v1, %v257_v18 }
 0x15c   :  { %v917_v23 = vpack.c.bf16 %v259_v20, %v258_v19  ;;  %v921_v24 = vpack.c.bf16 %v261_v22, %v260_v21 }
 0x15e   :  { %918 = vmatprep.subr.bf16.mxu1 %v917_v23 }
 0x15f   :  { %920 = vmatpush3.bf16.msra.mxu1 %v917_v23 }
 0x160   :  { %922 = vmatprep.subr.bf16.mxu1 %v921_v24 }
 0x163   :  { %924 = vmatpush3.bf16.msra.mxu1 %v921_v24 }
 0x164   :  { %927 = vmatprep.subr.msk.bf16.mxu1 %vm1095_vm1, %v925_v27 }
 0x166   :  { %818 = vmatmul.mubr.msk.f32.vlgmr.msra.gmra.mrb[0].mxu1 %vm72_vm0, %v1242_v28 }
 0x167   :  { %852 = vmatprep.mubr.msk.f32.mxu1 %vm72_vm0, %v1111_v8  ;;  %v359_v8 = vld [vmem:[%s1369_s1 + $0x30] sm:$0xff]  ;;  %s1048_s1 = smov [#allocation2]  }
 0x168   :  { %v943_v42 = vpack.c.bf16 %v360_v41, %v359_v8  ;;  %s659_s27 = sshll.u32 %s1048_s1, 4  ;;  %s660_s27 = int_to_ptr.vmem [resolvable:$true] %s659_s27 }
 0x169   :  { %s1023_s28 = scalar_lea.vmem %s660_s27, 16  ;;  %s1027_s29 = scalar_lea.vmem %s660_s27, 32 }
 0x16a   :  { %p1024_p0 = scmp.ne.s32.totalorder %s660_s27, %s1023_s28  ;;  %p1028_p1 = scmp.lt.s32.totalorder %s660_s27, %s660_s27 }
 0x16b   :  { %p1029_p2 = scmp.lt.s32.totalorder %s1027_s29, %s1023_s28 }
 0x16c   :  { %930 = vmatpush3.bf16.xpose.msk.msra.mxu1 %vm1095_vm1, %v925_v27 }
 0x16d   :  { %933 = vmatprep.subr.msk.bf16.mxu1 %vm1095_vm1, %v931_v31  ;;  %p1030_p3 = por %p1029_p2, %p1028_p1 }
 0x16f   :  { %p1031_p4 = pnand %p1030_p3, %p1024_p0 }
 0x174   :  { %936 = vmatpush3.bf16.xpose.msk.msra.mxu1 %vm1095_vm1, %v931_v31 }
 0x175   :  { %939 = vmatprep.subr.msk.bf16.mxu1 %vm1095_vm1, %v937_v40 }
 0x17c   :  { %942 = vmatpush3.bf16.xpose.msk.msra.mxu1 %vm1095_vm1, %v937_v40 }
 0x17d   :  { %945 = vmatprep.subr.msk.bf16.mxu1 %vm1095_vm1, %v943_v42 }
 0x184   :  { %948 = vmatpush3.bf16.xpose.msk.msra.mxu1 %vm1095_vm1, %v943_v42 }
 0x185   :  { %951 = vmatprep.subr.msk.bf16.mxu1 %vm1095_vm1, %v949_v46 }
 0x18c   :  { %954 = vmatpush3.bf16.xpose.msk.msra.mxu1 %vm1095_vm1, %v949_v46 }
 0x18d   :  { %957 = vmatprep.subr.msk.bf16.mxu1 %vm1095_vm1, %v955_v49 }
 0x194   :  { %960 = vmatpush3.bf16.xpose.msk.msra.mxu1 %vm1095_vm1, %v955_v49 }
 0x195   :  { %963 = vmatprep.subr.msk.bf16.mxu1 %vm1095_vm1, %v961_v52 }
 0x19c   :  { %966 = vmatpush3.bf16.xpose.msk.msra.mxu1 %vm1095_vm1, %v961_v52 }
 0x19d   :  { %969 = vmatprep.subr.msk.bf16.mxu1 %vm1095_vm1, %v967_v55 }
 0x1a4   :  { %972 = vmatpush3.bf16.xpose.msk.msra.mxu1 %vm1095_vm1, %v967_v55 }
 0x1ab   :  { %853 = vmatmul.mubr.msk.f32.vlgmr.msra.gmra.mrb[2].mxu1 %vm72_vm0, %v1198_v33 }
 0x1ac   :  { %855 = vmatprep.mubr.msk.f32.mxu1 %vm72_vm0, %v1203_v34 }
 0x1af   :  { %856 = vmatmul.mubr.msk.f32.gmra.mrb[4].mxu1 %vm72_vm0, %v1212_v35 }
 0x239   :  { %v819_v57 = vpop.f32.mrb[0].mxu1 }
 0x23a   :  { %v1333_v59 = vadd.f32 %v819_v57, %v1328_v56  ;;  %v344_v60 = vpop.f32.mrb[1].mxu1 }
 0x23b   :  { %v1336_v4 = vadd.f32 %v344_v60, %v1330_v58 }
 0x23c   :  { %v631_v33 = vmul.f32 %v1333_v59, %v1333_v59 }
 0x23d   :  { %v630_v34 = vmul.f32 %v1336_v4, %v1336_v4 }
 0x23f   :  { %v1342_v61 = vadd.f32 %v631_v33, %v630_v34 }
 0x241   :  { %v633_v48 = vrot.slane %v1342_v61, 4 }
 0x243   :  { %v634_v52 = vadd.f32 %v633_v48, %v1342_v61 }
 0x245   :  { %v635_v33 = vrot.slane %v634_v52, 2 }
 0x27e   :  { %v854_v35 = vpop.f32.mrb[2].mxu1 }
 0x27f   :  { %v489_v62 = vadd.f32 %v854_v35, %v1225_v39  ;;  %v483_v63 = vpop.f32.mrb[3].mxu1 }
 0x280   :  { %v484_v0 = vadd.f32 %v483_v63, %v1221_v37 }
 0x281   :  { %v714_v1 = vmul.f32 -1.442695, %v489_v62  ;;  %v636_v62 = vadd.f32 %v635_v33, %v634_v52 }
 0x282   :  { %v713_v2 = vmul.f32 -1.442695, %v484_v0  ;;  %v857_v3 = vpop.f32.mrb[4].mxu1 }
 0x283   :  { %1003 = vpow2.f32 %v714_v1  ;;  %v499_v5 = vadd.f32 %v857_v3, %v1229_v45  ;;  %v493_v6 = vpop.f32.mrb[5].mxu1 }
 0x284   :  { %1005 = vpow2.f32 %v713_v2  ;;  %v494_v7 = vadd.f32 %v493_v6, %v1223_v38 }
 0x285   :  { %v716_v9 = vmul.f32 -1.442695, %v499_v5 }
 0x286   :  { %v715_v10 = vmul.f32 -1.442695, %v494_v7 }
 0x287   :  { %1007 = vpow2.f32 %v716_v9 }
 0x288   :  { %1009 = vpow2.f32 %v715_v10 }
 0x28d   :  { %v1004_v11 = vpop.eup %1003 }
 0x28e   :  { %v1006_v12 = vpop.eup %1005  ;;  %v515_v39 = vadd.f32 1.0, %v1004_v11 }
 0x28f   :  { %v514_v13 = vadd.f32 1.0, %v1006_v12 }
 0x290   :  { %1011 = vrcp.f32 %v515_v39 }
 0x291   :  { %v1008_v37 = vpop.eup %1007  ;;  %1013 = vrcp.f32 %v514_v13 }
 0x292   :  { %v1010_v14 = vpop.eup %1009  ;;  %v517_v15 = vadd.f32 1.0, %v1008_v37 }
 0x293   :  { %v516_v16 = vadd.f32 1.0, %v1010_v14 }
 0x294   :  { %1015 = vrcp.f32 %v517_v15 }
 0x295   :  { %1017 = vrcp.f32 %v516_v16 }
 0x29a   :  { %v1012_v45 = vpop.eup %1011 }
 0x29b   :  { %v1014_v17 = vpop.eup %1013  ;;  %v527_v18 = vmul.f32 %v1012_v45, %v1012_v45 }
 0x29c   :  { %v526_v38 = vmul.f32 %v1014_v17, %v1014_v17 }
 0x29e   :  { %v1016_v19 = vpop.eup %1015  ;;  %v530_v20 = vadd.f32 %v527_v18, %v526_v38 }
 0x29f   :  { %v1018_v21 = vpop.eup %1017  ;;  %v529_v23 = vmul.f32 %v1016_v19, %v1016_v19 }
 0x2a0   :  { %v528_v22 = vmul.f32 %v1018_v21, %v1018_v21 }
 0x2a2   :  { %v531_v24 = vadd.f32 %v530_v20, %v528_v22 }
 0x2a4   :  { %v532_v25 = vadd.f32 %v531_v24, %v529_v23 }
 0x2a6   :  { %v533_v26 = vrot.slane %v532_v25, 4 }
 0x2a8   :  { %v534_v27 = vadd.f32 %v533_v26, %v532_v25 }
 0x2aa   :  { %v535_v29 = vrot.slane %v534_v27, 2 }
 0x2ac   :  { %v536_v30 = vadd.f32 %v535_v29, %v534_v27 }
 0x2ae   :  { %v537_v31 = vrot.slane %v536_v30, 1 }
 0x2b0   :  { %v538_v32 = vadd.f32 %v537_v31, %v536_v30 }
 0x2b2   :  { %v539_v36 = vmax.f32 %v538_v32, 1e-24 }
 0x2b4   :  { %1019 = vrsqrt.f32 %v539_v36 }
 0x2be   :  { %v1020_v40 = vpop.eup %1019 }
 0x2bf   :  { %v541_v8 = vmul.f32 0.1, %v1020_v40 }
 0x2c1   :  { %v542_v41 = vmul.f32 %v1014_v17, %v541_v8  ;;  %v543_v42 = vmul.f32 %v1012_v45, %v541_v8  ;;  %v544_v43 = vmul.f32 %v1018_v21, %v541_v8  ;;  %v545_v44 = vmul.f32 %v1016_v19, %v541_v8 }
 0x2c3   :  { %v973_v46 = vpack.c.bf16 %v543_v42, %v542_v41  ;;  %v977_v47 = vpack.c.bf16 %v545_v44, %v544_v43 }
 0x2c5   :  { %974 = vmatprep.subr.bf16.mxu0 %v973_v46 }
 0x2c6   :  { %976 = vmatpush3.bf16.msra.mxu0 %v973_v46 }
 0x2c7   :  { %978 = vmatprep.subr.bf16.mxu0 %v977_v47 }
 0x2ca   :  { %980 = vmatpush3.bf16.msra.mxu0 %v977_v47 }
 0x2cd   :  { %867 = vmatmul.mubr.msk.f32.vlgmr.msra.gmra.mrb[4].mxu0 %vm72_vm0, %v1242_v28 }
 0x3a0   :  { %v868_v49 = vpop.f32.mrb[4].mxu0 }
 0x3a1   :  { %v618_v50 = vadd.f32 %v868_v49, %v1328_v56  ;;  %v612_v51 = vpop.f32.mrb[5].mxu0  ;;  %v637_v56 = vrot.slane %v636_v62, 1 }
 0x3a2   :  { %v613_v53 = vadd.f32 %v612_v51, %v1330_v58 }
 0x3a3   :  { %v622_v54 = vmul.f32 %v618_v50, %v1333_v59  ;;  %v640_v55 = vmul.f32 %v618_v50, %v618_v50  ;;  %v638_v5 = vadd.f32 %v637_v56, %v636_v62 }
 0x3a4   :  { %v621_v57 = vmul.f32 %v613_v53, %v1336_v4  ;;  %v639_v60 = vmul.f32 %v613_v53, %v613_v53 }
 0x3a6   :  { %v623_v34 = vadd.f32 %v622_v54, %v621_v57  ;;  %v641_v35 = vadd.f32 %v640_v55, %v639_v60 }
 0x3a8   :  { %v642_v28 = vrot.slane %v641_v35, 4  ;;  %v624_v1 = vrot.slane %v623_v34, 4 }
 0x3aa   :  { %v643_v63 = vadd.f32 %v642_v28, %v641_v35  ;;  %v625_v61 = vadd.f32 %v624_v1, %v623_v34 }
 0x3ac   :  { %v644_v0 = vrot.slane %v643_v63, 2  ;;  %v626_v59 = vrot.slane %v625_v61, 2 }
 0x3ae   :  { %v645_v2 = vadd.f32 %v644_v0, %v643_v63  ;;  %v627_v4 = vadd.f32 %v626_v59, %v625_v61 }
 0x3b0   :  { %v646_v3 = vrot.slane %v645_v2, 1  ;;  %v628_v9 = vrot.slane %v627_v4, 1 }
 0x3b2   :  { %v647_v58 = vadd.f32 %v646_v3, %v645_v2  ;;  %v629_v10 = vadd.f32 %v628_v9, %v627_v4 }
 0x3b4   :  { %v648_v6 = vmul.f32 %v647_v58, %v638_v5 }
 0x3b6   :  { %v649_v7 = vmax.f32 %v648_v6, 1e-16 }
 0x3b8   :  { %1021 = vrsqrt.f32 %v649_v7 }
 0x3c2   :  { %v1022_v11 = vpop.eup %1021 }
 0x3c3   :  { %v651_v12 = vmul.f32 %v1022_v11, %v629_v10 }
 0x3c5   :  { %652 = vst [vmem:[#allocation2] sm:$0x1] %v651_v12 }
 0x3c6   :  { %1034 = shalt.err (!%p1031_p4)
}
 0x3c7   :  { %s1035_s4 = scalar_lea.hbm %s1374_s6, 16 }
 0x3c8   :  { %p1036_p5 = scmp.ne.s32.totalorder %s1374_s6, %s1035_s4  ;;  %p1039_p6 = scmp.lt.u32.totalorder %s1035_s4, %s1374_s6 }
 0x3ca   :  { %p1041_p7 = pnand %p1039_p6, %p1036_p5 }
 0x3cc   :  { %1044 = shalt.err (!%p1041_p7)
}
 0x3cd   :  { %662 = dma.vmem_to_hbm [thread:$0]  %s660_s27, 16, %s1374_s6, [#allocation3]  }
 0x3ce   :  { %1045 = dma.done.wait [#allocation3], 16  }
 0x3cf   :  { %1046 = vsyncadd [#allocation3], 4294967280 }
 0x3d0   :  { %666 = vsyncpa [#allocation3], 1 }

</bundles_post_ra>
